<compile_context>
chip_gen: v5e
topology: v5e:2x2
jax: 0.10.0
libtpu: 0.0.40
codegen_flags: <defaults>
</compile_context>

<pallas_src>
import numpy as np
import jax
import jax.numpy as jnp
from jax.experimental import pallas as pl
from jax.experimental.pallas import tpu as pltpu


def _round_up(x, m):
    return ((x + m - 1) // m) * m


def _vmem_limit_bytes():
    """Generation-aware scoped-VMEM budget (bytes)."""
    try:
        info = pltpu.get_tpu_info()
        cap = int(getattr(info, "vmem_capacity_bytes", 0))
        if cap > 0:
            # ~96 MiB on 128 MiB parts (v5e/v6e), ~48 MiB on 64 MiB parts (v7x).
            return int(min(96 * 2**20, (cap * 3) // 4))
    except Exception:
        pass
    return 48 * 2**20  # conservative fallback, safe on every generation


# -----------------------------------------------------------------------------
# Kernel: one grid step = one tile of rows.
#   h   = x @ w1 + b1              (bf16 x bf16 -> f32 acc on the MXU)
#   h   = LayerNorm(h) (one-pass f32 stats) ; ReLU ; Dropout == identity
#   out = h @ w2 + b2              (bf16 x bf16 -> f32 acc)
# -----------------------------------------------------------------------------
def _proj_head_kernel(x_ref, w1_ref, vecs_ref, w2_ref, b2_ref, out_ref):
    # In-kernel cast to bf16 (VPU op, hidden under the matmul); x is DMA'd in
    # its native dtype so the wrapper never adds an extra HBM cast pass.
    x = x_ref[...].astype(jnp.bfloat16)               # (tM, D)
    w1 = w1_ref[...]                                   # (D, D)    bf16
    w2 = w2_ref[...]                                   # (D, Dp)   bf16

    b1 = vecs_ref[0:1, :]                              # (1, D) f32
    gamma = vecs_ref[1:2, :]                           # (1, D) f32
    beta = vecs_ref[2:3, :]                            # (1, D) f32

    # ---- Linear 1 (MXU, f32 accumulation) ----
    h = jnp.dot(x, w1, preferred_element_type=jnp.float32) + b1    # (tM, D) f32

    # ---- LayerNorm: one-pass statistics, var = E[h^2] - mu^2 (f32) ----
    mu = jnp.mean(h, axis=-1, keepdims=True)
    ms = jnp.mean(h * h, axis=-1, keepdims=True)
    var = ms - mu * mu
    h = (h - mu) * jax.lax.rsqrt(var + 1e-5) * gamma + beta

    # ---- ReLU ----
    h = jnp.maximum(h, 0.0)

    # TODO(synk): nn.Dropout(0.2) train-mode masking (pltpu.prng_*) not ported;
    # identity here matches eval / deterministic behaviour.

    # ---- Linear 2 (lane-dense padded output dim) ----
    out = jnp.dot(h.astype(jnp.bfloat16), w2,
                  preferred_element_type=jnp.float32) + b2_ref[...]  # (tM, Dp)
    out_ref[...] = out.astype(out_ref.dtype)


# -----------------------------------------------------------------------------
# Parameter init (PyTorch nn.Linear / nn.LayerNorm defaults)
# -----------------------------------------------------------------------------
def init_params(key, input_dim, output_dim):
    def linear(k, fan_in, fan_out):
        kw, kb = jax.random.split(k)
        lim = 1.0 / np.sqrt(fan_in)
        w = jax.random.uniform(kw, (fan_in, fan_out), jnp.float32, -lim, lim)
        b = jax.random.uniform(kb, (fan_out,), jnp.float32, -lim, lim)
        return w, b

    k1, k2 = jax.random.split(key)
    w1, b1 = linear(k1, input_dim, input_dim)
    w2, b2 = linear(k2, input_dim, output_dim)
    return {
        'w1': w1, 'b1': b1,
        'gamma': jnp.ones((input_dim,), jnp.float32),
        'beta': jnp.zeros((input_dim,), jnp.float32),
        'w2': w2, 'b2': b2,
    }


# -----------------------------------------------------------------------------
# One-time parameter preprocessing (hoisted out of the per-call path):
#   * bf16 matmul weights
#   * b1 / gamma / beta packed into one (3, D) f32 array (one DMA)
#   * w2 / b2 padded along the output dim to a multiple of 128 lanes
# -----------------------------------------------------------------------------
def prepare_params(params):
    D = params['w1'].shape[0]
    D_out = params['w2'].shape[1]
    D_pad = max(_round_up(D_out, 128), 128)

    w2 = params['w2'].astype(jnp.bfloat16)
    b2 = params['b2'].reshape(1, D_out).astype(jnp.float32)
    if D_pad != D_out:
        w2 = jnp.pad(w2, ((0, 0), (0, D_pad - D_out)))
        b2 = jnp.pad(b2, ((0, 0), (0, D_pad - D_out)))

    return {
        'w1': params['w1'].astype(jnp.bfloat16),                       # (D, D)
        'vecs': jnp.stack([params['b1'], params['gamma'], params['beta']],
                          axis=0).astype(jnp.float32),                 # (3, D)
        'w2': w2,                                                      # (D, Dp)
        'b2': b2,                                                      # (1, Dp)
        'input_dim': D,
        'output_dim': D_out,
        'output_dim_padded': D_pad,
    }


def _invariant_spec(shape, single_buffer):
    """Grid-invariant BlockSpec; single VMEM buffer when supported."""
    index_map = lambda i: (0,) * len(shape)
    if single_buffer:
        return pl.BlockSpec(shape, index_map, pipeline_mode=pl.Buffered(1))
    return pl.BlockSpec(shape, index_map)


# -----------------------------------------------------------------------------
# Wrapper: ProjHead.forward semantics for x of shape (..., input_dim)
# -----------------------------------------------------------------------------
def proj_head_forward(x, prepared, *, tile_rows=512, out_dtype=jnp.float32):
    D = prepared['input_dim']
    D_out = prepared['output_dim']
    Dp = prepared['output_dim_padded']
    orig_lead = x.shape[:-1]
    assert x.shape[-1] == D

    M = int(np.prod(orig_lead)) if orig_lead else 1
    x2 = x.reshape(M, D)   # native dtype; bf16 cast happens inside the kernel

    vmem_limit = _vmem_limit_bytes()

    # ---- Row tile selection ----------------------------------------------
    # Multiple of 8 sublanes, capped at the padded row count; >=256 tiles are
    # rounded to a multiple of 256 (MXU height on v6e/v7x).
    tM = max(8, min(int(tile_rows), _round_up(M, 8)))
    tM = _round_up(tM, 8)
    if tM >= 256:
        tM = (tM // 256) * 256

    # Cap tM so weights (conservatively assume double-buffered) plus the
    # double-buffered x/out tiles and f32 intermediates fit the VMEM budget.
    weight_bytes = (D * D + D * Dp) * 2 + 3 * D * 4 + Dp * 4
    per_row_bytes = (D * 4) * 2 + (Dp * 4) * 2 + (D * 4) * 2
    budget = max(vmem_limit - 2 * weight_bytes, 1 * 2**20)
    tM_cap = max(8, (budget // per_row_bytes) // 8 * 8)
    tM = min(tM, tM_cap)
    # TODO(synk): for very large D (e.g. D>=4096 bf16 on v7x's 64 MiB VMEM) the
    # weights themselves exceed the budget; that case needs a K-tiled first
    # matmul (trailing "arbitrary" grid axis + f32 accumulator + pl.when).

    M_pad = _round_up(M, tM)
    if M_pad != M:
        x2 = jnp.pad(x2, ((0, M_pad - M), (0, 0)))

    grid = (M_pad // tM,)

    def run(single_buffer):
        in_specs = [
            pl.BlockSpec((tM, D), lambda i: (i, 0)),          # x: streamed per row tile
            _invariant_spec((D, D), single_buffer),           # w1
            _invariant_spec((3, D), single_buffer),           # packed b1/gamma/beta
            _invariant_spec((D, Dp), single_buffer),          # w2 (lane-padded)
            _invariant_spec((1, Dp), single_buffer),          # b2 (lane-padded)
        ]
        out_specs = pl.BlockSpec((tM, Dp), lambda i: (i, 0))
        return pl.pallas_call(
            _proj_head_kernel,
            grid=grid,
            in_specs=in_specs,
            out_specs=out_specs,
            out_shape=jax.ShapeDtypeStruct((M_pad, Dp), out_dtype),
            compiler_params=pltpu.CompilerParams(
                dimension_semantics=("parallel",),
                vmem_limit_bytes=vmem_limit,
            ),
        )(x2, prepared['w1'], prepared['vecs'], prepared['w2'], prepared['b2'])

    try:
        out = run(single_buffer=True)
    except Exception:
        # Fallback for jax versions without pipeline_mode / Buffered(1) support.
        out = run(single_buffer=False)

    out = out[:M, :D_out]
    return out.reshape(*orig_lead, D_out)


# -----------------------------------------------------------------------------
# Pure-JAX f32 reference (literal translation of the PyTorch forward)
# -----------------------------------------------------------------------------
def reference_forward(x, p):
    h = x @ p['w1'] + p['b1']
    mu = jnp.mean(h, axis=-1, keepdims=True)
    var = jnp.mean(jnp.square(h - mu), axis=-1, keepdims=True)
    h = (h - mu) / jnp.sqrt(var + 1e-5) * p['gamma'] + p['beta']
    h = jnp.maximum(h, 0.0)
    return h @ p['w2'] + p['b2']


if __name__ == "__main__":
    # Small shapes consistent with a projection head applied to a batch of
    # token embeddings: (batch, seq, input_dim) -> (batch, seq, output_dim)
    B, S = 2, 8
    D_IN, D_OUT = 64, 32

    key = jax.random.PRNGKey(0)
    key_p, key_x = jax.random.split(key)
    params = init_params(key_p, D_IN, D_OUT)
    x = jax.random.normal(key_x, (B, S, D_IN), jnp.float32)

    prepared = prepare_params(params)   # one-time weight preprocessing

    # tile_rows=8 so the demo actually exercises the row-tiled grid (grid=(2,))
    y = proj_head_forward(x, prepared, tile_rows=8)
    jax.block_until_ready(y)

    # correctness check against the f32 reference (bf16 matmuls -> loose tol)
    y_ref = reference_forward(x, params)
    np.testing.assert_allclose(np.asarray(y), np.asarray(y_ref),
                               rtol=3e-2, atol=3e-2)
    assert y.shape == (B, S, D_OUT)

    print("KERNEL_OK")
</pallas_src>

<mosaic_0001>
module attributes {stable_mosaic.version = 11 : i64} {
  func.func @_proj_head_kernel(%arg0: i32, %arg1: memref<8x64xf32, #tpu.memory_space<vmem>>, %arg2: memref<64x64xbf16, #tpu.memory_space<vmem>>, %arg3: memref<3x64xf32, #tpu.memory_space<vmem>>, %arg4: memref<64x128xbf16, #tpu.memory_space<vmem>>, %arg5: memref<1x128xf32, #tpu.memory_space<vmem>>, %arg6: memref<8x128xf32, #tpu.memory_space<vmem>>) attributes {dimension_semantics = [#tpu.dimension_semantics<parallel>], iteration_bounds = array<i64: 2>, scalar_prefetch = 0 : i64, scratch_operands = 0 : i64, tpu.core_type = #tpu.core_type<tc>, window_params = [{transform_indices = @transform_0, window_bounds = array<i64: 8, 64>}, {pipeline_mode = #tpu.pipeline_mode<synchronous>, transform_indices = @transform_1, window_bounds = array<i64: 64, 64>}, {pipeline_mode = #tpu.pipeline_mode<synchronous>, transform_indices = @transform_2, window_bounds = array<i64: 3, 64>}, {pipeline_mode = #tpu.pipeline_mode<synchronous>, transform_indices = @transform_3, window_bounds = array<i64: 64, 128>}, {pipeline_mode = #tpu.pipeline_mode<synchronous>, transform_indices = @transform_4, window_bounds = array<i64: 1, 128>}, {transform_indices = @transform_5, window_bounds = array<i64: 8, 128>}]} {
    %c0 = arith.constant 0 : index
    %c0_0 = arith.constant 0 : index
    %0 = vector.load %arg1[%c0, %c0_0] : memref<8x64xf32, #tpu.memory_space<vmem>>, vector<8x64xf32>
    %1 = arith.truncf %0 : vector<8x64xf32> to vector<8x64xbf16>
    %c0_1 = arith.constant 0 : index
    %c0_2 = arith.constant 0 : index
    %2 = vector.load %arg2[%c0_1, %c0_2] : memref<64x64xbf16, #tpu.memory_space<vmem>>, vector<64x64xbf16>
    %c0_3 = arith.constant 0 : index
    %c0_4 = arith.constant 0 : index
    %3 = vector.load %arg4[%c0_3, %c0_4] : memref<64x128xbf16, #tpu.memory_space<vmem>>, vector<64x128xbf16>
    %c0_5 = arith.constant 0 : index
    %c0_6 = arith.constant 0 : index
    %4 = vector.load %arg3[%c0_5, %c0_6] : memref<3x64xf32, #tpu.memory_space<vmem>>, vector<1x64xf32>
    %c1 = arith.constant 1 : index
    %c0_7 = arith.constant 0 : index
    %5 = vector.load %arg3[%c1, %c0_7] : memref<3x64xf32, #tpu.memory_space<vmem>>, vector<1x64xf32>
    %c2 = arith.constant 2 : index
    %c0_8 = arith.constant 0 : index
    %6 = vector.load %arg3[%c2, %c0_8] : memref<3x64xf32, #tpu.memory_space<vmem>>, vector<1x64xf32>
    %cst = arith.constant dense<0.000000e+00> : vector<8x64xf32>
    %7 = tpu.matmul %1, %2, %cst {dimension_numbers = #tpu.dot_dimension_numbers<[1], [0], [0], [1], [0, 0, 1, 1], [], []>} : vector<8x64xbf16>, vector<64x64xbf16>, vector<8x64xf32> -> vector<8x64xf32>
    %8 = vector.broadcast %4 : vector<1x64xf32> to vector<8x64xf32>
    %9 = arith.addf %7, %8 : vector<8x64xf32>
    %cst_9 = arith.constant dense<0.000000e+00> : vector<8xf32>
    %10 = vector.multi_reduction <add>, %9, %cst_9 [1] : vector<8x64xf32> to vector<8xf32>
    %11 = vector.shape_cast %10 : vector<8xf32> to vector<8x1xf32>
    %cst_10 = arith.constant 6.400000e+01 : f32
    %12 = vector.broadcast %cst_10 : f32 to vector<8x1xf32>
    %13 = arith.divf %11, %12 : vector<8x1xf32>
    %14 = arith.mulf %9, %9 : vector<8x64xf32>
    %cst_11 = arith.constant dense<0.000000e+00> : vector<8xf32>
    %15 = vector.multi_reduction <add>, %14, %cst_11 [1] : vector<8x64xf32> to vector<8xf32>
    %16 = vector.shape_cast %15 : vector<8xf32> to vector<8x1xf32>
    %cst_12 = arith.constant 6.400000e+01 : f32
    %17 = vector.broadcast %cst_12 : f32 to vector<8x1xf32>
    %18 = arith.divf %16, %17 : vector<8x1xf32>
    %19 = arith.mulf %13, %13 : vector<8x1xf32>
    %20 = arith.subf %18, %19 : vector<8x1xf32>
    %21 = vector.broadcast %13 : vector<8x1xf32> to vector<8x64xf32>
    %22 = arith.subf %9, %21 : vector<8x64xf32>
    %cst_13 = arith.constant 9.99999974E-6 : f32
    %23 = vector.broadcast %cst_13 : f32 to vector<8x1xf32>
    %24 = arith.addf %20, %23 : vector<8x1xf32>
    %25 = math.rsqrt %24 : vector<8x1xf32>
    %26 = vector.broadcast %25 : vector<8x1xf32> to vector<8x64xf32>
    %27 = arith.mulf %22, %26 : vector<8x64xf32>
    %28 = vector.broadcast %5 : vector<1x64xf32> to vector<8x64xf32>
    %29 = arith.mulf %27, %28 : vector<8x64xf32>
    %30 = vector.broadcast %6 : vector<1x64xf32> to vector<8x64xf32>
    %31 = arith.addf %29, %30 : vector<8x64xf32>
    %cst_14 = arith.constant 0.000000e+00 : f32
    %32 = vector.broadcast %cst_14 : f32 to vector<8x64xf32>
    %33 = arith.maximumf %31, %32 : vector<8x64xf32>
    %34 = arith.truncf %33 : vector<8x64xf32> to vector<8x64xbf16>
    %cst_15 = arith.constant dense<0.000000e+00> : vector<8x128xf32>
    %35 = tpu.matmul %34, %3, %cst_15 {dimension_numbers = #tpu.dot_dimension_numbers<[1], [0], [0], [1], [0, 0, 1, 1], [], []>} : vector<8x64xbf16>, vector<64x128xbf16>, vector<8x128xf32> -> vector<8x128xf32>
    %c0_16 = arith.constant 0 : index
    %c0_17 = arith.constant 0 : index
    %36 = vector.load %arg5[%c0_16, %c0_17] : memref<1x128xf32, #tpu.memory_space<vmem>>, vector<1x128xf32>
    %37 = vector.broadcast %36 : vector<1x128xf32> to vector<8x128xf32>
    %38 = arith.addf %35, %37 : vector<8x128xf32>
    %c0_18 = arith.constant 0 : index
    %c0_19 = arith.constant 0 : index
    %39 = vector.load %arg6[%c0_18, %c0_19] : memref<8x128xf32, #tpu.memory_space<vmem>>, vector<8x128xf32>
    tpu.vector_store %arg6[%c0_18, %c0_19], %38 {strides = array<i32>} : memref<8x128xf32, #tpu.memory_space<vmem>>, vector<8x128xf32>,
    return
  }
  func.func @transform_0(%arg0: i32) -> (i32, i32) {
    %c0_i32 = arith.constant 0 : i32
    %c0_i32_0 = arith.constant 0 : i32
    return %arg0, %c0_i32 : i32, i32
  }
  func.func @transform_1(%arg0: i32) -> (i32, i32) {
    %c0_i32 = arith.constant 0 : i32
    %c0_i32_0 = arith.constant 0 : i32
    %c0_i32_1 = arith.constant 0 : i32
    return %c0_i32, %c0_i32_0 : i32, i32
  }
  func.func @transform_2(%arg0: i32) -> (i32, i32) {
    %c0_i32 = arith.constant 0 : i32
    %c0_i32_0 = arith.constant 0 : i32
    %c0_i32_1 = arith.constant 0 : i32
    return %c0_i32, %c0_i32_0 : i32, i32
  }
  func.func @transform_3(%arg0: i32) -> (i32, i32) {
    %c0_i32 = arith.constant 0 : i32
    %c0_i32_0 = arith.constant 0 : i32
    %c0_i32_1 = arith.constant 0 : i32
    return %c0_i32, %c0_i32_0 : i32, i32
  }
  func.func @transform_4(%arg0: i32) -> (i32, i32) {
    %c0_i32 = arith.constant 0 : i32
    %c0_i32_0 = arith.constant 0 : i32
    %c0_i32_1 = arith.constant 0 : i32
    return %c0_i32, %c0_i32_0 : i32, i32
  }
  func.func @transform_5(%arg0: i32) -> (i32, i32) {
    %c0_i32 = arith.constant 0 : i32
    %c0_i32_0 = arith.constant 0 : i32
    return %arg0, %c0_i32 : i32, i32
  }
}

module attributes {stable_mosaic.version = 11 : i64} {
  func.func @_proj_head_kernel(%arg0: i32, %arg1: memref<8x64xf32, #tpu.memory_space<vmem>>, %arg2: memref<64x64xbf16, #tpu.memory_space<vmem>>, %arg3: memref<3x64xf32, #tpu.memory_space<vmem>>, %arg4: memref<64x128xbf16, #tpu.memory_space<vmem>>, %arg5: memref<1x128xf32, #tpu.memory_space<vmem>>, %arg6: memref<8x128xf32, #tpu.memory_space<vmem>>) attributes {dimension_semantics = [#tpu.dimension_semantics<parallel>], iteration_bounds = array<i64: 2>, scalar_prefetch = 0 : i64, scratch_operands = 0 : i64, tpu.core_type = #tpu.core_type<tc>, window_params = [{transform_indices = @transform_0, window_bounds = array<i64: 8, 64>}, {pipeline_mode = #tpu.pipeline_mode<synchronous>, transform_indices = @transform_1, window_bounds = array<i64: 64, 64>}, {pipeline_mode = #tpu.pipeline_mode<synchronous>, transform_indices = @transform_2, window_bounds = array<i64: 3, 64>}, {pipeline_mode = #tpu.pipeline_mode<synchronous>, transform_indices = @transform_3, window_bounds = array<i64: 64, 128>}, {pipeline_mode = #tpu.pipeline_mode<synchronous>, transform_indices = @transform_4, window_bounds = array<i64: 1, 128>}, {transform_indices = @transform_5, window_bounds = array<i64: 8, 128>}]} {
    %c0 = arith.constant 0 : index
    %c0_0 = arith.constant 0 : index
    %0 = vector.load %arg1[%c0, %c0_0] : memref<8x64xf32, #tpu.memory_space<vmem>>, vector<8x64xf32>
    %1 = arith.truncf %0 : vector<8x64xf32> to vector<8x64xbf16>
    %c0_1 = arith.constant 0 : index
    %c0_2 = arith.constant 0 : index
    %2 = vector.load %arg2[%c0_1, %c0_2] : memref<64x64xbf16, #tpu.memory_space<vmem>>, vector<64x64xbf16>
    %c0_3 = arith.constant 0 : index
    %c0_4 = arith.constant 0 : index
    %3 = vector.load %arg4[%c0_3, %c0_4] : memref<64x128xbf16, #tpu.memory_space<vmem>>, vector<64x128xbf16>
    %c0_5 = arith.constant 0 : index
    %c0_6 = arith.constant 0 : index
    %4 = vector.load %arg3[%c0_5, %c0_6] : memref<3x64xf32, #tpu.memory_space<vmem>>, vector<1x64xf32>
    %c1 = arith.constant 1 : index
    %c0_7 = arith.constant 0 : index
    %5 = vector.load %arg3[%c1, %c0_7] : memref<3x64xf32, #tpu.memory_space<vmem>>, vector<1x64xf32>
    %c2 = arith.constant 2 : index
    %c0_8 = arith.constant 0 : index
    %6 = vector.load %arg3[%c2, %c0_8] : memref<3x64xf32, #tpu.memory_space<vmem>>, vector<1x64xf32>
    %cst = arith.constant dense<0.000000e+00> : vector<8x64xf32>
    %7 = tpu.matmul %1, %2, %cst {dimension_numbers = #tpu.dot_dimension_numbers<[1], [0], [0], [1], [0, 0, 1, 1], [], []>} : vector<8x64xbf16>, vector<64x64xbf16>, vector<8x64xf32> -> vector<8x64xf32>
    %8 = vector.broadcast %4 : vector<1x64xf32> to vector<8x64xf32>
    %9 = arith.addf %7, %8 : vector<8x64xf32>
    %cst_9 = arith.constant dense<0.000000e+00> : vector<8xf32>
    %10 = vector.multi_reduction <add>, %9, %cst_9 [1] : vector<8x64xf32> to vector<8xf32>
    %11 = vector.shape_cast %10 : vector<8xf32> to vector<8x1xf32>
    %cst_10 = arith.constant 6.400000e+01 : f32
    %12 = vector.broadcast %cst_10 : f32 to vector<8x1xf32>
    %13 = arith.divf %11, %12 : vector<8x1xf32>
    %14 = arith.mulf %9, %9 : vector<8x64xf32>
    %cst_11 = arith.constant dense<0.000000e+00> : vector<8xf32>
    %15 = vector.multi_reduction <add>, %14, %cst_11 [1] : vector<8x64xf32> to vector<8xf32>
    %16 = vector.shape_cast %15 : vector<8xf32> to vector<8x1xf32>
    %cst_12 = arith.constant 6.400000e+01 : f32
    %17 = vector.broadcast %cst_12 : f32 to vector<8x1xf32>
    %18 = arith.divf %16, %17 : vector<8x1xf32>
    %19 = arith.mulf %13, %13 : vector<8x1xf32>
    %20 = arith.subf %18, %19 : vector<8x1xf32>
    %21 = vector.broadcast %13 : vector<8x1xf32> to vector<8x64xf32>
    %22 = arith.subf %9, %21 : vector<8x64xf32>
    %cst_13 = arith.constant 9.99999974E-6 : f32
    %23 = vector.broadcast %cst_13 : f32 to vector<8x1xf32>
    %24 = arith.addf %20, %23 : vector<8x1xf32>
    %25 = math.rsqrt %24 : vector<8x1xf32>
    %26 = vector.broadcast %25 : vector<8x1xf32> to vector<8x64xf32>
    %27 = arith.mulf %22, %26 : vector<8x64xf32>
    %28 = vector.broadcast %5 : vector<1x64xf32> to vector<8x64xf32>
    %29 = arith.mulf %27, %28 : vector<8x64xf32>
    %30 = vector.broadcast %6 : vector<1x64xf32> to vector<8x64xf32>
    %31 = arith.addf %29, %30 : vector<8x64xf32>
    %cst_14 = arith.constant 0.000000e+00 : f32
    %32 = vector.broadcast %cst_14 : f32 to vector<8x64xf32>
    %33 = arith.maximumf %31, %32 : vector<8x64xf32>
    %34 = arith.truncf %33 : vector<8x64xf32> to vector<8x64xbf16>
    %cst_15 = arith.constant dense<0.000000e+00> : vector<8x128xf32>
    %35 = tpu.matmul %34, %3, %cst_15 {dimension_numbers = #tpu.dot_dimension_numbers<[1], [0], [0], [1], [0, 0, 1, 1], [], []>} : vector<8x64xbf16>, vector<64x128xbf16>, vector<8x128xf32> -> vector<8x128xf32>
    %c0_16 = arith.constant 0 : index
    %c0_17 = arith.constant 0 : index
    %36 = vector.load %arg5[%c0_16, %c0_17] : memref<1x128xf32, #tpu.memory_space<vmem>>, vector<1x128xf32>
    %37 = vector.broadcast %36 : vector<1x128xf32> to vector<8x128xf32>
    %38 = arith.addf %35, %37 : vector<8x128xf32>
    %c0_18 = arith.constant 0 : index
    %c0_19 = arith.constant 0 : index
    %39 = vector.load %arg6[%c0_18, %c0_19] : memref<8x128xf32, #tpu.memory_space<vmem>>, vector<8x128xf32>
    tpu.vector_store %arg6[%c0_18, %c0_19], %38 {strides = array<i32>} : memref<8x128xf32, #tpu.memory_space<vmem>>, vector<8x128xf32>,
    return
  }
  func.func @transform_0(%arg0: i32) -> (i32, i32) {
    %c0_i32 = arith.constant 0 : i32
    %c0_i32_0 = arith.constant 0 : i32
    return %arg0, %c0_i32 : i32, i32
  }
  func.func @transform_1(%arg0: i32) -> (i32, i32) {
    %c0_i32 = arith.constant 0 : i32
    %c0_i32_0 = arith.constant 0 : i32
    %c0_i32_1 = arith.constant 0 : i32
    return %c0_i32, %c0_i32_0 : i32, i32
  }
  func.func @transform_2(%arg0: i32) -> (i32, i32) {
    %c0_i32 = arith.constant 0 : i32
    %c0_i32_0 = arith.constant 0 : i32
    %c0_i32_1 = arith.constant 0 : i32
    return %c0_i32, %c0_i32_0 : i32, i32
  }
  func.func @transform_3(%arg0: i32) -> (i32, i32) {
    %c0_i32 = arith.constant 0 : i32
    %c0_i32_0 = arith.constant 0 : i32
    %c0_i32_1 = arith.constant 0 : i32
    return %c0_i32, %c0_i32_0 : i32, i32
  }
  func.func @transform_4(%arg0: i32) -> (i32, i32) {
    %c0_i32 = arith.constant 0 : i32
    %c0_i32_0 = arith.constant 0 : i32
    %c0_i32_1 = arith.constant 0 : i32
    return %c0_i32, %c0_i32_0 : i32, i32
  }
  func.func @transform_5(%arg0: i32) -> (i32, i32) {
    %c0_i32 = arith.constant 0 : i32
    %c0_i32_0 = arith.constant 0 : i32
    return %arg0, %c0_i32 : i32, i32
  }
}

</mosaic_0001>

<bundles_post_ra>
// kernel: tpu_custom_call.1
= control target key start
LH: loop header
LB: loop body
LE: loop exit
PB: predicated region body
PF: predicated region fallthrough
CT: control target
= control target key end

     0   :  { %10 = vsyncpa [#allocation3], 0  ;;  %s1098_s0 = inlined_call_operand.hbm [shape: f32[16,64], index: 0, kind: input, shape index: {}]   ;;  %s1099_s1 = inlined_call_operand.hbm [shape: bf16[64,64], index: 1, kind: input, shape index: {}]   ;;  %s1100_s2 = inlined_call_operand.hbm [shape: f32[3,64], index: 2, kind: input, shape index: {}]   ;;  %s1101_s3 = inlined_call_operand.hbm [shape: bf16[64,128], index: 3, kind: input, shape index: {}]   ;;  %s1102_s4 = inlined_call_operand.vmem [shape: f32[1,128], index: 4, kind: input, shape index: {}]   ;;  %s1103_s5 = inlined_call_operand.hbm [shape: f32[16,128], index: 5, kind: output, shape index: {}]  }
   0x1   :  { %12 = vsyncpa [#allocation3 + $0x1], 0 }
   0x2   :  { %13 = vsyncpa [#allocation6], 0 }
   0x3   :  { %14 = vsyncpa [#allocation9], 0 }
   0x4   :  { %15 = vsyncpa [#allocation4], 0 }
   0x5   :  { %17 = vsyncpa [#allocation4 + $0x1], 0  ;;  %s931_s18 = smov 0   ;;  %s933_s19 = smov 0  }
   0x6   :  { %s935_s20 = smov 0   ;;  %s937_s21 = smov 0  }
   0x7 LB: > { %s175_s24 = sshll.u32 %s1099_s1, 4  ;;  %s955_s25 = sadd.s32 4294967295, %s893_s21   ;;  %s893_s21 = sphi %s937_s21, %s1114_s21   ;;  %s889_s20 = sphi %s935_s20, %s1113_s20   ;;  %s885_s19 = sphi %s933_s19, %s1112_s19   ;;  %s881_s18 = sphi %s931_s18, %s1111_s18   ;;  %s176_s24 = int_to_ptr.hbm [resolvable:$true] %s175_s24 }
   0x8   : > { %p552_p0 = scmp.ge.s32.totalorder %s893_s21, 1  ;;  %p44_p1 = scmp.eq.s32.totalorder %s955_s25, 0 }
   0x9   : > { %p164_p2 = scmp.lt.s32.totalorder %s893_s21, 3  ;;  %s895_s27 = smov [#allocation5]  }
   0xa   : > { %s177_s28 = sshll.u32 %s895_s27, 4  ;;  %s190_s6 = sshll.u32 %s1100_s2, 4  ;;  %s178_s28 = int_to_ptr.vmem [resolvable:$true] %s177_s28  ;;  %s191_s6 = int_to_ptr.hbm [resolvable:$true] %s190_s6 }
   0xb   : > { %p960_p3 = pnand %p552_p0, %p164_p2  ;;  %s201_s10 = sshll.u32 %s1101_s3, 4  ;;  %s202_s10 = int_to_ptr.hbm [resolvable:$true] %s201_s10 }
   0xc   : > { %s896_s11 = smov [#allocation7]   ;;  %s897_s13 = smov 64  }
   0xd   : > { %p627_p4 = pneg %p960_p3  ;;  %s192_s12 = sshll.u32 %s896_s11, 4  ;;  %s193_s12 = int_to_ptr.vmem [resolvable:$true] %s192_s12 }
   0xe   : > { %s898_s14 = smov 4   ;;  %s899_s15 = smov [#allocation8]  }
   0xf   : > { %p972_p6 = pnand %p627_p4, %p44_p1  ;;  %s203_s16 = sshll.u32 %s899_s15, 4  ;;  %s204_s16 = int_to_ptr.vmem [resolvable:$true] %s203_s16 }
  0x10   : > { %s551_s17 = sadd.s32 4294967294, %s893_s21   ;;  %s987_s22 = sadd.s32 1, %s893_s21  }
  0x11   : > { %630 = dma.hbm_to_vmem [thread:$0]  (!%p972_p6), %s176_s24, 512, %s178_s28, [#allocation6], %s897_s13, %s897_s13, %s898_s14  }
  0x12   : > { %633 = dma.hbm_to_vmem [thread:$0]  (!%p972_p6), %s191_s6, 64, %s193_s12, [#allocation6]  }
  0x13   : > { %636 = dma.hbm_to_vmem [thread:$0]  (!%p972_p6), %s202_s10, 512, %s204_s16, [#allocation9], %s897_s13, %s897_s13, %s898_s14  }
  0x14   : > { %s30_s23 = sadd.s32 1, %s889_s20  ;;  %s27_s24 = ssub.s32 %s893_s21, %s987_s22 }
  0x15   : > { %p37_p7 = scmp.ne.s32.totalorder %s889_s20, %s885_s19  ;;  %p28_p8 = scmp.eq.s32.totalorder %s27_s24, 0 }
  0x16   : > { %p38_p9 = scmp.eq.s32.totalorder %s893_s21, 0  ;;  %p43_p10 = scmp.ne.s32.totalorder %s885_s19, %s881_s18 }
  0x17   : > { %p151_p11 = scmp.eq.s32.totalorder %s955_s25, 1  ;;  %p157_p0 = scmp.eq.s32.totalorder %s551_s17, 1 }
  0x18   : > { %s999_s27 = scalar_select %p28_p8, %s889_s20, %s30_s23  }
  0x19   : > { %p1003_p12 = por %p44_p1, %p43_p10  ;;  %p1007_p13 = por %p151_p11, %p37_p7 }
  0x1a   : > { %p39_p2 = por %p38_p9, %p37_p7  ;;  %s220_s30 = sand.u32 1, %s889_s20  }
  0x1b   : > { %p1012_p4 = por %p157_p0, %p43_p10  ;;  %p648_p6 = scmp.lt.s32.totalorder %s893_s21, 2 }
  0x1c   : > { %s557_s7 = sshll.u32 %s220_s30, 3  ;;  %s558_s8 = sshll.u32 %s893_s21, 3 }
  0x1d   : > { %s228_s11 = scalar_lea.hbm %s1098_s0, %s558_s8  ;;  %s224_s13 = scalar_lea.vmem [#allocation2], %s557_s7 }
  0x1e   : > { %s230_s12 = sshll.u32 %s228_s11, 4  ;;  %s232_s14 = sshll.u32 %s224_s13, 4  ;;  %s231_s12 = int_to_ptr.hbm [resolvable:$true] %s230_s12  ;;  %s233_s14 = int_to_ptr.vmem [resolvable:$true] %s232_s14 }
  0x1f   : > { %p1021_p8 = pnand %p648_p6, %p39_p2  ;;  %s221_s16 = scalar_lea.sflag [#allocation3], %s220_s30 }
  0x20   : > { %s789_s17 = sshra.s32 %s231_s12, 4  ;;  %s796_s7 = scalar_lea.hbm %s1098_s0, 16  ;;  %s790_s17 = int_to_ptr.hbm [resolvable:$true] %s789_s17 }
  0x21   : > { %s791_s23 = scalar_lea.hbm %s790_s17, 8  ;;  %p793_p9 = pneg %p1021_p8 }
  0x22   : > { %p792_p7 = scmp.ne.s32.totalorder %s790_s17, %s791_s23  ;;  %p797_p0 = scmp.lt.s32.totalorder %s790_s17, %s1098_s0 }
  0x23   : > { %p798_p2 = scmp.lt.s32.totalorder %s796_s7, %s791_s23 }
  0x24   : > { %p794_p10 = pnand %p793_p9, %p792_p7 }
  0x25   : > { %p799_p6 = por %p798_p2, %p797_p0 }
  0x26   : > { %p795_p11 = pneg %p794_p10 }
  0x28   : > { %p800_p5 = pnand %p799_p6, %p795_p11 }
  0x2a   : > { %803 = shalt.err (!%p800_p5)
}
  0x2b   : > { %640 = dma.hbm_to_vmem [thread:$0]  (!%p1021_p8), %s231_s12, 128, %s233_s14, %s221_s16  }
  0x2c   : > { %241 = sbr.rel (%p960_p3) target bundleno = 491 (0x1eb), region = 40  ;;  %s1038_s30 = sand.u32 (!%p960_p3), 1, %s885_s19  }
  0x2d   : > { %s560_s11 = sshll.u32 (!%p960_p3), %s1038_s30, 3  ;;  %s244_s13 = scalar_lea.sflag (!%p960_p3), [#allocation3], %s1038_s30 }
  0x2e   : > { %s247_s17 = scalar_lea.vmem (!%p960_p3), [#allocation2], %s560_s11 }
  0x31   : > { %864 = dma.done.wait (%p1003_p12), %s244_s13, 128  }
  0x32   : > { %866 = vsyncadd (%p1003_p12), %s244_s13, 4294967168 }
  0x33   : > { %868 = dma.done.wait (%p44_p1), [#allocation6], 576  }
  0x34   : > { %870 = vsyncadd (%p44_p1), [#allocation6], 4294966720 }
  0x35   : > { %872 = dma.done.wait (%p44_p1), [#allocation9], 512  }
  0x36   : > { %874 = vsyncadd (%p44_p1), [#allocation9], 4294966784  ;;  %v606_v0 = vld [vmem:[#allocation5 + $0x18] sm:$0xff]  ;;  %v605_v1 = vld [vmem:[#allocation5 + $0x10] sm:$0xff]  ;;  %vm337_vm0 = vcmask 523264   ;;  %v900_v13 = vmov 64.0  }
  0x37   : > { %345 = vmatpush.bf16.msra.mxu0 %v606_v0  ;;  %v604_v2 = vld [vmem:[#allocation5 + $0x8] sm:$0xff]  ;;  %v603_v3 = vld [vmem:[#allocation5] sm:$0xff]  ;;  %v291_v4 = vld [vmem:[%s247_s17] sm:$0xff]  ;;  %695 = vrcp.f32 %v900_v13  ;;  %s600_s26 = sshll.u32 %s955_s25, 3  ;;  %s289_s23 = scalar_lea.vmem [#allocation10], %s560_s11 }
  0x38   : > { %v292_v5 = vpack.c.bf16 %v291_v4, %v291_v4  ;;  %v691_v6 = vld [vmem:[#allocation7] ss:$0 sm:$0xff]  ;;  %v609_v20 = vld [vmem:[#allocation8 + $0x10] sm:$0xff]  ;;  %v608_v22 = vld [vmem:[#allocation8 + $0x8] sm:$0xff]  ;;  %s447_s14 = scalar_lea.hbm %s1103_s5, %s600_s26  ;;  %s449_s24 = sshll.u32 %s289_s23, 4  ;;  %s450_s24 = int_to_ptr.vmem [resolvable:$true] %s449_s24 }
  0x39   : > { %v610_v18 = vld [vmem:[#allocation8 + $0x18] sm:$0xff]  ;;  %v607_v24 = vld [vmem:[#allocation8] sm:$0xff]  ;;  %v694_v46 = vld [vmem:[%s1102_s4] ss:$0 sm:$0xff]  ;;  %s451_s8 = sshll.u32 %s447_s14, 4  ;;  %s437_s7 = scalar_lea.sflag [#allocation4], %s1038_s30  ;;  %s452_s8 = int_to_ptr.hbm [resolvable:$true] %s451_s8 }
  0x3a   : > { %426 = vmatpush.bf16.msra.mxu1 %v610_v18  ;;  %v692_v38 = vld [vmem:[#allocation7 + $0x1] ss:$0 sm:$0xff]  ;;  %v693_v41 = vld [vmem:[#allocation7 + $0x2] ss:$0 sm:$0xff]  ;;  %s833_s25 = sshra.s32 %s452_s8, 4  ;;  %s839_s17 = scalar_lea.hbm %s1103_s5, 16  ;;  %s834_s25 = int_to_ptr.hbm [resolvable:$true] %s833_s25 }
  0x3b   : > { %346 = vmatpush.bf16.msra.mxu0 %v605_v1  ;;  %s835_s9 = scalar_lea.hbm %s834_s25, 8  ;;  %p840_p12 = scmp.lt.s32.totalorder %s834_s25, %s1103_s5 }
  0x3c   : > { %p836_p1 = scmp.ne.s32.totalorder %s834_s25, %s835_s9  ;;  %p841_p8 = scmp.lt.s32.totalorder %s839_s17, %s835_s9 }
  0x3d   : > { %v696_v14 = vpop.eup %695 }
  0x3e   : > { %v358_v15 = vmul.f32 64.0, %v696_v14  ;;  %vm362_vm1 = vweird.f32 %v696_v14  ;;  %427 = vmatpush.bf16.msra.mxu1 %v609_v20  ;;  %p837_p3 = pnand %p836_p1, %p1007_p13  ;;  %p842_p7 = por %p841_p8, %p840_p12 }
  0x3f   : > { %347 = vmatpush.bf16.msra.mxu0 %v604_v2 }
  0x40   : > { %v359_v16 = vsub.f32 1.0, %v358_v15  ;;  %p838_p5 = pneg %p837_p3 }
  0x42   : > { %v360_v17 = vmul.f32 %v696_v14, %v359_v16  ;;  %428 = vmatpush.bf16.msra.mxu1 %v608_v22  ;;  %p843_p9 = pnand %p842_p7, %p838_p5 }
  0x43   : > { %348 = vmatpush.bf16.msra.mxu0 %v603_v3 }
  0x44   : > { %v361_v19 = vadd.f32 %v696_v14, %v360_v17 }
  0x46   : > { %581 = vmatmul.msk.bf16.vlgmr.msra.gmra.mxu0 %vm337_vm0, %v292_v5  ;;  %v363_v23 = vsel %vm362_vm1, %v696_v14, %v361_v19  ;;  %429 = vmatpush.bf16.msra.mxu1 %v607_v24 }
  0xc3   : > { %v350_v7 = vpop.f32.mrf.mxu0 }
  0xc4   : > { %v351_v8 = vadd.f32 %v691_v6, %v350_v7 }
  0xc6   : > { %v354_v9 = vsel %vm337_vm0, %v351_v8, 0.0  ;;  %v365_v10 = vmul.f32 %v351_v8, %v351_v8 }
  0xc7   : > { %355 = vadd.xlane.f32.xlu0 %v354_v9 }
  0xc8   : > { %v366_v12 = vsel %vm337_vm0, %v365_v10, 0.0 }
  0xcb   : > { %v352_v11 = vpop.f32.mrf.mxu0 }
  0xcf   : > { %367 = vadd.xlane.f32.xlu0 %v366_v12 }
 0x13a   : > { %v356_v21 = vpop.xlane.xlu0 %355 }
 0x13b   : > { %v364_v25 = vmul.f32 %v363_v23, %v356_v21 }
 0x13d   : > { %v370_v27 = vmul.f32 %v364_v25, %v364_v25  ;;  %v372_v37 = vsub.f32 %v351_v8, %v364_v25 }
 0x142   : > { %v368_v26 = vpop.xlane.xlu0 %367 }
 0x143   : > { %v369_v28 = vmul.f32 %v368_v26, %v363_v23 }
 0x145   : > { %v371_v29 = vsub.f32 %v369_v28, %v370_v27 }
 0x147   : > { %v373_v30 = vadd.f32 1e-05, %v371_v29 }
 0x149   : > { %697 = vrsqrt.f32 %v373_v30  ;;  %vm380_vm3 = vweird.f32 %v373_v30 }
 0x14f   : > { %v698_v31 = vpop.eup %697 }
 0x150   : > { %v375_v32 = vmul.f32 %v698_v31, %v373_v30  ;;  %vm381_vm2 = vweird.f32 %v698_v31 }
 0x151   : > { %vm382_vm4 = vmor %vm380_vm3, %vm381_vm2 }
 0x152   : > { %v376_v33 = vmul.f32 %v698_v31, %v375_v32 }
 0x154   : > { %v377_v34 = vmul.f32 0.5, %v376_v33 }
 0x156   : > { %v378_v35 = vsub.f32 1.5, %v377_v34 }
 0x158   : > { %v379_v36 = vmul.f32 %v698_v31, %v378_v35 }
 0x15a   : > { %v383_v39 = vsel %vm382_vm4, %v698_v31, %v379_v36 }
 0x15b   : > { %v384_v40 = vmul.f32 %v383_v39, %v372_v37 }
 0x15d   : > { %v386_v42 = vmul.f32 %v692_v38, %v384_v40 }
 0x15f   : > { %v388_v43 = vadd.f32 %v693_v41, %v386_v42 }
 0x161   : > { %v389_v44 = vmax.f32 %v388_v43, 0.0 }
 0x163   : > { %v390_v45 = vpack.c.bf16 %v389_v44, %v389_v44 }
 0x165   : > { %598 = vmatmul.msk.bf16.vlgmr.msra.gmra.mxu1 %vm337_vm0, %v390_v45 }
 0x1e2   : > { %v431_v47 = vpop.f32.mrf.mxu1 }
 0x1e3   : > { %v432_v48 = vadd.f32 %v694_v46, %v431_v47 }
 0x1e5   : > { %435 = vst [vmem:[%s289_s23] sm:$0xff] %v432_v48 }
 0x1e6   : > { %846 = shalt.err (!%p843_p9)
}
 0x1e7   : > { %625 = dma.vmem_to_hbm [thread:$0]  (%p1007_p13), %s450_s24, 128, %s452_s8, %s437_s7  }
 0x1ea   : > { %v433_v49 = vpop.f32.mrf.mxu1 }
 0x1eb PF: > { %s463_s30 = sand.u32 1, %s881_s18   ;;  %p1110_p10 = scmp.ge.s32.totalorder %s893_s21, 2 }
 0x1ec   : > { %s464_s28 = scalar_lea.sflag [#allocation4], %s463_s30 }
 0x1ed   : > { %p642_p11 = pnand %p1110_p10, %p1012_p4 }
 0x1ef   : > { %p643_p0 = pneg %p642_p11 }
 0x1f1   : > { %876 = dma.done.wait (%p643_p0), %s464_s28, 128  }
 0x1f2   : > { %878 = vsyncadd (%p643_p0), %s464_s28, 4294967168  ;;  %p20_p2 = scmp.ge.s32.totalorder %s987_s22, 4   ;;  %s1111_s18 = smov %s885_s19 }
 0x1f3   : > { %s1112_s19 = smov %s889_s20  ;;  %s1113_s20 = smov %s999_s27 }
 0x1f4   : > { %s1114_s21 = smov %s987_s22  ;;  %22 = sbr.rel (!%p20_p2) target bundleno = 7 (0x7), region = 97 }
 0x1f9   :  { %470 = vsyncpa [#allocation3], 1 }
 0x1fa   :  { %472 = vsyncpa [#allocation3 + $0x1], 1 }
 0x1fb   :  { %473 = vsyncpa [#allocation6], 1 }
 0x1fc   :  { %474 = vsyncpa [#allocation9], 1 }
 0x1fd   :  { %475 = vsyncpa [#allocation4], 1 }
 0x1fe   :  { %477 = vsyncpa [#allocation4 + $0x1], 1 }

// kernel: tpu_custom_call.1
= control target key start
LH: loop header
LB: loop body
LE: loop exit
PB: predicated region body
PF: predicated region fallthrough
CT: control target
= control target key end

     0   :  { %10 = vsyncpa [#allocation3], 0  ;;  %s1098_s0 = inlined_call_operand.hbm [shape: f32[16,64], index: 0, kind: input, shape index: {}]   ;;  %s1099_s1 = inlined_call_operand.hbm [shape: bf16[64,64], index: 1, kind: input, shape index: {}]   ;;  %s1100_s2 = inlined_call_operand.hbm [shape: f32[3,64], index: 2, kind: input, shape index: {}]   ;;  %s1101_s3 = inlined_call_operand.hbm [shape: bf16[64,128], index: 3, kind: input, shape index: {}]   ;;  %s1102_s4 = inlined_call_operand.vmem [shape: f32[1,128], index: 4, kind: input, shape index: {}]   ;;  %s1103_s5 = inlined_call_operand.hbm [shape: f32[16,128], index: 5, kind: output, shape index: {}]  }
   0x1   :  { %12 = vsyncpa [#allocation3 + $0x1], 0 }
   0x2   :  { %13 = vsyncpa [#allocation6], 0 }
   0x3   :  { %14 = vsyncpa [#allocation9], 0 }
   0x4   :  { %15 = vsyncpa [#allocation4], 0 }
   0x5   :  { %17 = vsyncpa [#allocation4 + $0x1], 0  ;;  %s931_s18 = smov 0   ;;  %s933_s19 = smov 0  }
   0x6   :  { %s935_s20 = smov 0   ;;  %s937_s21 = smov 0  }
   0x7 LB: > { %s175_s24 = sshll.u32 %s1099_s1, 4  ;;  %s955_s25 = sadd.s32 4294967295, %s893_s21   ;;  %s893_s21 = sphi %s937_s21, %s1114_s21   ;;  %s889_s20 = sphi %s935_s20, %s1113_s20   ;;  %s885_s19 = sphi %s933_s19, %s1112_s19   ;;  %s881_s18 = sphi %s931_s18, %s1111_s18   ;;  %s176_s24 = int_to_ptr.hbm [resolvable:$true] %s175_s24 }
   0x8   : > { %p552_p0 = scmp.ge.s32.totalorder %s893_s21, 1  ;;  %p44_p1 = scmp.eq.s32.totalorder %s955_s25, 0 }
   0x9   : > { %p164_p2 = scmp.lt.s32.totalorder %s893_s21, 3  ;;  %s895_s27 = smov [#allocation5]  }
   0xa   : > { %s177_s28 = sshll.u32 %s895_s27, 4  ;;  %s190_s6 = sshll.u32 %s1100_s2, 4  ;;  %s178_s28 = int_to_ptr.vmem [resolvable:$true] %s177_s28  ;;  %s191_s6 = int_to_ptr.hbm [resolvable:$true] %s190_s6 }
   0xb   : > { %p960_p3 = pnand %p552_p0, %p164_p2  ;;  %s201_s10 = sshll.u32 %s1101_s3, 4  ;;  %s202_s10 = int_to_ptr.hbm [resolvable:$true] %s201_s10 }
   0xc   : > { %s896_s11 = smov [#allocation7]   ;;  %s897_s13 = smov 64  }
   0xd   : > { %p627_p4 = pneg %p960_p3  ;;  %s192_s12 = sshll.u32 %s896_s11, 4  ;;  %s193_s12 = int_to_ptr.vmem [resolvable:$true] %s192_s12 }
   0xe   : > { %s898_s14 = smov 4   ;;  %s899_s15 = smov [#allocation8]  }
   0xf   : > { %p972_p6 = pnand %p627_p4, %p44_p1  ;;  %s203_s16 = sshll.u32 %s899_s15, 4  ;;  %s204_s16 = int_to_ptr.vmem [resolvable:$true] %s203_s16 }
  0x10   : > { %s551_s17 = sadd.s32 4294967294, %s893_s21   ;;  %s987_s22 = sadd.s32 1, %s893_s21  }
  0x11   : > { %630 = dma.hbm_to_vmem [thread:$0]  (!%p972_p6), %s176_s24, 512, %s178_s28, [#allocation6], %s897_s13, %s897_s13, %s898_s14  }
  0x12   : > { %633 = dma.hbm_to_vmem [thread:$0]  (!%p972_p6), %s191_s6, 64, %s193_s12, [#allocation6]  }
  0x13   : > { %636 = dma.hbm_to_vmem [thread:$0]  (!%p972_p6), %s202_s10, 512, %s204_s16, [#allocation9], %s897_s13, %s897_s13, %s898_s14  }
  0x14   : > { %s30_s23 = sadd.s32 1, %s889_s20  ;;  %s27_s24 = ssub.s32 %s893_s21, %s987_s22 }
  0x15   : > { %p37_p7 = scmp.ne.s32.totalorder %s889_s20, %s885_s19  ;;  %p28_p8 = scmp.eq.s32.totalorder %s27_s24, 0 }
  0x16   : > { %p38_p9 = scmp.eq.s32.totalorder %s893_s21, 0  ;;  %p43_p10 = scmp.ne.s32.totalorder %s885_s19, %s881_s18 }
  0x17   : > { %p151_p11 = scmp.eq.s32.totalorder %s955_s25, 1  ;;  %p157_p0 = scmp.eq.s32.totalorder %s551_s17, 1 }
  0x18   : > { %s999_s27 = scalar_select %p28_p8, %s889_s20, %s30_s23  }
  0x19   : > { %p1003_p12 = por %p44_p1, %p43_p10  ;;  %p1007_p13 = por %p151_p11, %p37_p7 }
  0x1a   : > { %p39_p2 = por %p38_p9, %p37_p7  ;;  %s220_s30 = sand.u32 1, %s889_s20  }
  0x1b   : > { %p1012_p4 = por %p157_p0, %p43_p10  ;;  %p648_p6 = scmp.lt.s32.totalorder %s893_s21, 2 }
  0x1c   : > { %s557_s7 = sshll.u32 %s220_s30, 3  ;;  %s558_s8 = sshll.u32 %s893_s21, 3 }
  0x1d   : > { %s228_s11 = scalar_lea.hbm %s1098_s0, %s558_s8  ;;  %s224_s13 = scalar_lea.vmem [#allocation2], %s557_s7 }
  0x1e   : > { %s230_s12 = sshll.u32 %s228_s11, 4  ;;  %s232_s14 = sshll.u32 %s224_s13, 4  ;;  %s231_s12 = int_to_ptr.hbm [resolvable:$true] %s230_s12  ;;  %s233_s14 = int_to_ptr.vmem [resolvable:$true] %s232_s14 }
  0x1f   : > { %p1021_p8 = pnand %p648_p6, %p39_p2  ;;  %s221_s16 = scalar_lea.sflag [#allocation3], %s220_s30 }
  0x20   : > { %s789_s17 = sshra.s32 %s231_s12, 4  ;;  %s796_s7 = scalar_lea.hbm %s1098_s0, 16  ;;  %s790_s17 = int_to_ptr.hbm [resolvable:$true] %s789_s17 }
  0x21   : > { %s791_s23 = scalar_lea.hbm %s790_s17, 8  ;;  %p793_p9 = pneg %p1021_p8 }
  0x22   : > { %p792_p7 = scmp.ne.s32.totalorder %s790_s17, %s791_s23  ;;  %p797_p0 = scmp.lt.s32.totalorder %s790_s17, %s1098_s0 }
  0x23   : > { %p798_p2 = scmp.lt.s32.totalorder %s796_s7, %s791_s23 }
  0x24   : > { %p794_p10 = pnand %p793_p9, %p792_p7 }
  0x25   : > { %p799_p6 = por %p798_p2, %p797_p0 }
  0x26   : > { %p795_p11 = pneg %p794_p10 }
  0x28   : > { %p800_p5 = pnand %p799_p6, %p795_p11 }
  0x2a   : > { %803 = shalt.err (!%p800_p5)
}
  0x2b   : > { %640 = dma.hbm_to_vmem [thread:$0]  (!%p1021_p8), %s231_s12, 128, %s233_s14, %s221_s16  }
  0x2c   : > { %241 = sbr.rel (%p960_p3) target bundleno = 491 (0x1eb), region = 40  ;;  %s1038_s30 = sand.u32 (!%p960_p3), 1, %s885_s19  }
  0x2d   : > { %s560_s11 = sshll.u32 (!%p960_p3), %s1038_s30, 3  ;;  %s244_s13 = scalar_lea.sflag (!%p960_p3), [#allocation3], %s1038_s30 }
  0x2e   : > { %s247_s17 = scalar_lea.vmem (!%p960_p3), [#allocation2], %s560_s11 }
  0x31   : > { %864 = dma.done.wait (%p1003_p12), %s244_s13, 128  }
  0x32   : > { %866 = vsyncadd (%p1003_p12), %s244_s13, 4294967168 }
  0x33   : > { %868 = dma.done.wait (%p44_p1), [#allocation6], 576  }
  0x34   : > { %870 = vsyncadd (%p44_p1), [#allocation6], 4294966720 }
  0x35   : > { %872 = dma.done.wait (%p44_p1), [#allocation9], 512  }
  0x36   : > { %874 = vsyncadd (%p44_p1), [#allocation9], 4294966784  ;;  %v606_v0 = vld [vmem:[#allocation5 + $0x18] sm:$0xff]  ;;  %v605_v1 = vld [vmem:[#allocation5 + $0x10] sm:$0xff]  ;;  %vm337_vm0 = vcmask 523264   ;;  %v900_v13 = vmov 64.0  }
  0x37   : > { %345 = vmatpush.bf16.msra.mxu0 %v606_v0  ;;  %v604_v2 = vld [vmem:[#allocation5 + $0x8] sm:$0xff]  ;;  %v603_v3 = vld [vmem:[#allocation5] sm:$0xff]  ;;  %v291_v4 = vld [vmem:[%s247_s17] sm:$0xff]  ;;  %695 = vrcp.f32 %v900_v13  ;;  %s600_s26 = sshll.u32 %s955_s25, 3  ;;  %s289_s23 = scalar_lea.vmem [#allocation10], %s560_s11 }
  0x38   : > { %v292_v5 = vpack.c.bf16 %v291_v4, %v291_v4  ;;  %v691_v6 = vld [vmem:[#allocation7] ss:$0 sm:$0xff]  ;;  %v609_v20 = vld [vmem:[#allocation8 + $0x10] sm:$0xff]  ;;  %v608_v22 = vld [vmem:[#allocation8 + $0x8] sm:$0xff]  ;;  %s447_s14 = scalar_lea.hbm %s1103_s5, %s600_s26  ;;  %s449_s24 = sshll.u32 %s289_s23, 4  ;;  %s450_s24 = int_to_ptr.vmem [resolvable:$true] %s449_s24 }
  0x39   : > { %v610_v18 = vld [vmem:[#allocation8 + $0x18] sm:$0xff]  ;;  %v607_v24 = vld [vmem:[#allocation8] sm:$0xff]  ;;  %v694_v46 = vld [vmem:[%s1102_s4] ss:$0 sm:$0xff]  ;;  %s451_s8 = sshll.u32 %s447_s14, 4  ;;  %s437_s7 = scalar_lea.sflag [#allocation4], %s1038_s30  ;;  %s452_s8 = int_to_ptr.hbm [resolvable:$true] %s451_s8 }
  0x3a   : > { %426 = vmatpush.bf16.msra.mxu1 %v610_v18  ;;  %v692_v38 = vld [vmem:[#allocation7 + $0x1] ss:$0 sm:$0xff]  ;;  %v693_v41 = vld [vmem:[#allocation7 + $0x2] ss:$0 sm:$0xff]  ;;  %s833_s25 = sshra.s32 %s452_s8, 4  ;;  %s839_s17 = scalar_lea.hbm %s1103_s5, 16  ;;  %s834_s25 = int_to_ptr.hbm [resolvable:$true] %s833_s25 }
  0x3b   : > { %346 = vmatpush.bf16.msra.mxu0 %v605_v1  ;;  %s835_s9 = scalar_lea.hbm %s834_s25, 8  ;;  %p840_p12 = scmp.lt.s32.totalorder %s834_s25, %s1103_s5 }
  0x3c   : > { %p836_p1 = scmp.ne.s32.totalorder %s834_s25, %s835_s9  ;;  %p841_p8 = scmp.lt.s32.totalorder %s839_s17, %s835_s9 }
  0x3d   : > { %v696_v14 = vpop.eup %695 }
  0x3e   : > { %v358_v15 = vmul.f32 64.0, %v696_v14  ;;  %vm362_vm1 = vweird.f32 %v696_v14  ;;  %427 = vmatpush.bf16.msra.mxu1 %v609_v20  ;;  %p837_p3 = pnand %p836_p1, %p1007_p13  ;;  %p842_p7 = por %p841_p8, %p840_p12 }
  0x3f   : > { %347 = vmatpush.bf16.msra.mxu0 %v604_v2 }
  0x40   : > { %v359_v16 = vsub.f32 1.0, %v358_v15  ;;  %p838_p5 = pneg %p837_p3 }
  0x42   : > { %v360_v17 = vmul.f32 %v696_v14, %v359_v16  ;;  %428 = vmatpush.bf16.msra.mxu1 %v608_v22  ;;  %p843_p9 = pnand %p842_p7, %p838_p5 }
  0x43   : > { %348 = vmatpush.bf16.msra.mxu0 %v603_v3 }
  0x44   : > { %v361_v19 = vadd.f32 %v696_v14, %v360_v17 }
  0x46   : > { %581 = vmatmul.msk.bf16.vlgmr.msra.gmra.mxu0 %vm337_vm0, %v292_v5  ;;  %v363_v23 = vsel %vm362_vm1, %v696_v14, %v361_v19  ;;  %429 = vmatpush.bf16.msra.mxu1 %v607_v24 }
  0xc3   : > { %v350_v7 = vpop.f32.mrf.mxu0 }
  0xc4   : > { %v351_v8 = vadd.f32 %v691_v6, %v350_v7 }
  0xc6   : > { %v354_v9 = vsel %vm337_vm0, %v351_v8, 0.0  ;;  %v365_v10 = vmul.f32 %v351_v8, %v351_v8 }
  0xc7   : > { %355 = vadd.xlane.f32.xlu0 %v354_v9 }
  0xc8   : > { %v366_v12 = vsel %vm337_vm0, %v365_v10, 0.0 }
  0xcb   : > { %v352_v11 = vpop.f32.mrf.mxu0 }
  0xcf   : > { %367 = vadd.xlane.f32.xlu0 %v366_v12 }
 0x13a   : > { %v356_v21 = vpop.xlane.xlu0 %355 }
 0x13b   : > { %v364_v25 = vmul.f32 %v363_v23, %v356_v21 }
 0x13d   : > { %v370_v27 = vmul.f32 %v364_v25, %v364_v25  ;;  %v372_v37 = vsub.f32 %v351_v8, %v364_v25 }
 0x142   : > { %v368_v26 = vpop.xlane.xlu0 %367 }
 0x143   : > { %v369_v28 = vmul.f32 %v368_v26, %v363_v23 }
 0x145   : > { %v371_v29 = vsub.f32 %v369_v28, %v370_v27 }
 0x147   : > { %v373_v30 = vadd.f32 1e-05, %v371_v29 }
 0x149   : > { %697 = vrsqrt.f32 %v373_v30  ;;  %vm380_vm3 = vweird.f32 %v373_v30 }
 0x14f   : > { %v698_v31 = vpop.eup %697 }
 0x150   : > { %v375_v32 = vmul.f32 %v698_v31, %v373_v30  ;;  %vm381_vm2 = vweird.f32 %v698_v31 }
 0x151   : > { %vm382_vm4 = vmor %vm380_vm3, %vm381_vm2 }
 0x152   : > { %v376_v33 = vmul.f32 %v698_v31, %v375_v32 }
 0x154   : > { %v377_v34 = vmul.f32 0.5, %v376_v33 }
 0x156   : > { %v378_v35 = vsub.f32 1.5, %v377_v34 }
 0x158   : > { %v379_v36 = vmul.f32 %v698_v31, %v378_v35 }
 0x15a   : > { %v383_v39 = vsel %vm382_vm4, %v698_v31, %v379_v36 }
 0x15b   : > { %v384_v40 = vmul.f32 %v383_v39, %v372_v37 }
 0x15d   : > { %v386_v42 = vmul.f32 %v692_v38, %v384_v40 }
 0x15f   : > { %v388_v43 = vadd.f32 %v693_v41, %v386_v42 }
 0x161   : > { %v389_v44 = vmax.f32 %v388_v43, 0.0 }
 0x163   : > { %v390_v45 = vpack.c.bf16 %v389_v44, %v389_v44 }
 0x165   : > { %598 = vmatmul.msk.bf16.vlgmr.msra.gmra.mxu1 %vm337_vm0, %v390_v45 }
 0x1e2   : > { %v431_v47 = vpop.f32.mrf.mxu1 }
 0x1e3   : > { %v432_v48 = vadd.f32 %v694_v46, %v431_v47 }
 0x1e5   : > { %435 = vst [vmem:[%s289_s23] sm:$0xff] %v432_v48 }
 0x1e6   : > { %846 = shalt.err (!%p843_p9)
}
 0x1e7   : > { %625 = dma.vmem_to_hbm [thread:$0]  (%p1007_p13), %s450_s24, 128, %s452_s8, %s437_s7  }
 0x1ea   : > { %v433_v49 = vpop.f32.mrf.mxu1 }
 0x1eb PF: > { %s463_s30 = sand.u32 1, %s881_s18   ;;  %p1110_p10 = scmp.ge.s32.totalorder %s893_s21, 2 }
 0x1ec   : > { %s464_s28 = scalar_lea.sflag [#allocation4], %s463_s30 }
 0x1ed   : > { %p642_p11 = pnand %p1110_p10, %p1012_p4 }
 0x1ef   : > { %p643_p0 = pneg %p642_p11 }
 0x1f1   : > { %876 = dma.done.wait (%p643_p0), %s464_s28, 128  }
 0x1f2   : > { %878 = vsyncadd (%p643_p0), %s464_s28, 4294967168  ;;  %p20_p2 = scmp.ge.s32.totalorder %s987_s22, 4   ;;  %s1111_s18 = smov %s885_s19 }
 0x1f3   : > { %s1112_s19 = smov %s889_s20  ;;  %s1113_s20 = smov %s999_s27 }
 0x1f4   : > { %s1114_s21 = smov %s987_s22  ;;  %22 = sbr.rel (!%p20_p2) target bundleno = 7 (0x7), region = 97 }
 0x1f9   :  { %470 = vsyncpa [#allocation3], 1 }
 0x1fa   :  { %472 = vsyncpa [#allocation3 + $0x1], 1 }
 0x1fb   :  { %473 = vsyncpa [#allocation6], 1 }
 0x1fc   :  { %474 = vsyncpa [#allocation9], 1 }
 0x1fd   :  { %475 = vsyncpa [#allocation4], 1 }
 0x1fe   :  { %477 = vsyncpa [#allocation4 + $0x1], 1 }

</bundles_post_ra>
